<compile_context>
chip_gen: v7x
topology: tpu7x:2x2x1
jax: 0.10.0
libtpu: 0.0.40
codegen_flags: <defaults>
</compile_context>

<pallas_src>
import jax
import jax.numpy as jnp
from jax import lax
from jax.experimental import pallas as pl
from jax.experimental.pallas import tpu as pltpu

_LANE = 128
_TILE_BYTES = 4 * 1024 * 1024       # per input, per grid step (constant bytes)
_VMEM_LIMIT = 32 * 1024 * 1024      # 2 inputs x 2 buffers x 4 MiB = 16 MiB + slack
_UNROLL = 8


def _is_dual_tensorcore():
    """Best effort: only v7x-class chips have 2 TensorCores per chip."""
    try:
        kind = jax.devices()[0].device_kind.lower()
    except Exception:
        return False
    return ("v7" in kind) or ("7x" in kind)


def _make_kernel(sub, block_rows, nb, inner_steps, last_valid, uniform):
    """Kernel closure; all geometry baked in as static Python ints."""
    full_slabs = block_rows // sub
    last_slabs = last_valid // sub

    def _slab_loop(pred_ref, gt_ref, nslabs):
        # Register-resident (sub,128) f32 carries; one VMEM write per grid step.
        def body(c, carry):
            s, a = carry
            r = pl.multiple_of(c * sub, sub)
            x = pred_ref[pl.ds(r, sub), :].astype(jnp.float32)
            y = gt_ref[pl.ds(r, sub), :].astype(jnp.float32)
            d = x - y
            return s + d * d, a + jnp.abs(d)

        z = jnp.zeros((sub, _LANE), jnp.float32)
        if nslabs <= 0:
            return z, z
        return lax.fori_loop(0, nslabs, body, (z, z),
                             unroll=min(_UNROLL, nslabs))

    def kernel(pred_ref, gt_ref, sq_ref, abs_ref, acc_sq, acc_abs):
        pid = pl.program_id(0)
        j = pl.program_id(1)

        @pl.when(j == 0)
        def _():
            acc_sq[...] = jnp.zeros_like(acc_sq)
            acc_abs[...] = jnp.zeros_like(acc_abs)

        if uniform:
            # Every grid step processes a full block: no branches in the hot path.
            s, a = _slab_loop(pred_ref, gt_ref, full_slabs)
            acc_sq[...] += s
            acc_abs[...] += a
        else:
            g = pid * inner_steps + j  # unclamped global block index

            @pl.when(g < nb - 1)
            def _():
                s, a = _slab_loop(pred_ref, gt_ref, full_slabs)
                acc_sq[...] += s
                acc_abs[...] += a

            @pl.when(g == nb - 1)
            def _():
                # Last (possibly partial) block: static slab count covers only
                # the valid rows, so no mask and no OOB reads are needed.
                s, a = _slab_loop(pred_ref, gt_ref, last_slabs)
                acc_sq[...] += s
                acc_abs[...] += a
            # g > nb - 1: padded "virtual" step of the 2-core split; skipped.

        @pl.when(j == pl.num_programs(1) - 1)
        def _():
            # Single cross-lane/sublane reduce per partition (raw sums; the
            # weighting and 1/N happen in the wrapper so the tiny JAX tail can
            # be folded in).
            sq_ref[...] = jnp.sum(acc_sq[...]).reshape(1, 1)
            abs_ref[...] = jnp.sum(acc_abs[...]).reshape(1, 1)

    return kernel


def hybrid_loss(predictions, ground_truth, weights=(1.0, 0.5)):
    """JAX/Pallas equivalent of HybridLoss.forward with MSE + L1 sub-losses.

    predictions / ground_truth: dicts with key 'pred' holding same-shape tensors.
    Returns {'loss', 'MSELoss', 'L1Loss'} (components already weighted, as in
    the PyTorch module which stores `loss_func(...)['loss'] * weight`).
    """
    pred = predictions["pred"]
    gt = ground_truth["pred"]
    assert pred.shape == gt.shape
    n = int(pred.size)
    w_mse, w_l1 = float(weights[0]), float(weights[1])
    inv_n = 1.0 / float(n)

    itemsize = pred.dtype.itemsize
    sub = max(8, (8 * 4) // itemsize)          # 8 rows (f32) / 16 rows (bf16)
    rows128 = n // _LANE                        # full 128-lane rows
    rows_k = (rows128 // sub) * sub             # rows the kernel reduces

    pred_flat = pred.reshape(-1)
    gt_flat = gt.reshape(-1)

    sq_total = jnp.float32(0.0)
    abs_total = jnp.float32(0.0)

    if rows_k > 0:
        # 2-D views of the aligned bulk.  When n % 128 == 0 (common case) this
        # is a pure reshape (no HBM copy); otherwise a single prefix slice.
        if n % _LANE == 0:
            pred2 = pred_flat.reshape(rows128, _LANE)
            gt2 = gt_flat.reshape(rows128, _LANE)
        else:
            pred2 = pred_flat[: rows_k * _LANE].reshape(rows_k, _LANE)
            gt2 = gt_flat[: rows_k * _LANE].reshape(rows_k, _LANE)

        # Constant-byte, dtype-aware tiles (4 MiB per input per grid step).
        block_rows_target = max(sub, (_TILE_BYTES // (_LANE * itemsize)) // sub * sub)
        block_rows = min(block_rows_target, rows_k)
        nb = -(-rows_k // block_rows)                      # real blocks
        last_valid = rows_k - (nb - 1) * block_rows        # rows in last block

        num_parts = 2 if (_is_dual_tensorcore() and nb >= 2) else 1
        inner_steps = -(-nb // num_parts)
        uniform = (last_valid == block_rows) and (num_parts * inner_steps == nb)

        kernel = _make_kernel(sub, block_rows, nb, inner_steps, last_valid, uniform)

        def data_map(p, j):
            # Clamp virtual blocks (2-way split padding) onto a real block so
            # the DMA never reads past the array; the kernel skips them.
            return (jnp.minimum(p * inner_steps + j, nb - 1), 0)

        data_spec = pl.BlockSpec((block_rows, _LANE), data_map)
        part_spec = pl.BlockSpec((1, 1), lambda p, j: (p, 0))

        sq_parts, abs_parts = pl.pallas_call(
            kernel,
            out_shape=(
                jax.ShapeDtypeStruct((num_parts, 1), jnp.float32),
                jax.ShapeDtypeStruct((num_parts, 1), jnp.float32),
            ),
            grid_spec=pltpu.PrefetchScalarGridSpec(
                num_scalar_prefetch=0,
                grid=(num_parts, inner_steps),
                in_specs=[data_spec, data_spec],
                out_specs=[part_spec, part_spec],
                scratch_shapes=[
                    pltpu.VMEM((sub, _LANE), jnp.float32),  # running sum of squares
                    pltpu.VMEM((sub, _LANE), jnp.float32),  # running sum of |diff|
                ],
            ),
            compiler_params=pltpu.CompilerParams(
                dimension_semantics=("parallel", "arbitrary"),
                vmem_limit_bytes=_VMEM_LIMIT,
            ),
        )(pred2, gt2)

        sq_total = sq_total + jnp.sum(sq_parts)
        abs_total = abs_total + jnp.sum(abs_parts)

    # Ragged tail (< sub*128 + 127 elements): tiny pure-JAX reduction instead
    # of a full-tensor pad/copy.
    tail = n - rows_k * _LANE
    if tail > 0:
        d_t = (pred_flat[rows_k * _LANE:].astype(jnp.float32)
               - gt_flat[rows_k * _LANE:].astype(jnp.float32))
        sq_total = sq_total + jnp.sum(d_t * d_t)
        abs_total = abs_total + jnp.sum(jnp.abs(d_t))

    mse = sq_total * (inv_n * w_mse)
    l1 = abs_total * (inv_n * w_l1)
    return {"loss": mse + l1, "MSELoss": mse, "L1Loss": l1}


def _reference(pred, gt, w_mse, w_l1):
    diff = pred.astype(jnp.float32) - gt.astype(jnp.float32)
    ref_mse = w_mse * jnp.mean(diff * diff)
    ref_l1 = w_l1 * jnp.mean(jnp.abs(diff))
    return ref_mse, ref_l1, ref_mse + ref_l1


if __name__ == "__main__":
    key = jax.random.PRNGKey(0)
    k_pred, k_gt, k_pred2, k_gt2 = jax.random.split(key, 4)

    # NCHW, small shapes: batch=2, channels=4, spatial=16x16 (n % 128 == 0 path).
    pred = jax.random.normal(k_pred, (2, 4, 16, 16), dtype=jnp.float32)
    gt = jax.random.normal(k_gt, (2, 4, 16, 16), dtype=jnp.float32)

    out = hybrid_loss({"pred": pred}, {"pred": gt}, weights=(1.0, 0.5))
    out = jax.block_until_ready(out)

    ref_mse, ref_l1, ref_total = _reference(pred, gt, 1.0, 0.5)
    assert jnp.allclose(out["MSELoss"], ref_mse, rtol=1e-5, atol=1e-6)
    assert jnp.allclose(out["L1Loss"], ref_l1, rtol=1e-5, atol=1e-6)
    assert jnp.allclose(out["loss"], ref_total, rtol=1e-5, atol=1e-6)

    # Ragged shape (n % 128 != 0): exercises the bulk-kernel + JAX-tail path.
    pred_r = jax.random.normal(k_pred2, (2, 3, 15, 17), dtype=jnp.float32)
    gt_r = jax.random.normal(k_gt2, (2, 3, 15, 17), dtype=jnp.float32)
    out_r = hybrid_loss({"pred": pred_r}, {"pred": gt_r}, weights=(1.0, 0.5))
    out_r = jax.block_until_ready(out_r)

    ref_mse_r, ref_l1_r, ref_total_r = _reference(pred_r, gt_r, 1.0, 0.5)
    assert jnp.allclose(out_r["MSELoss"], ref_mse_r, rtol=1e-5, atol=1e-6)
    assert jnp.allclose(out_r["L1Loss"], ref_l1_r, rtol=1e-5, atol=1e-6)
    assert jnp.allclose(out_r["loss"], ref_total_r, rtol=1e-5, atol=1e-6)

    print("KERNEL_OK")
</pallas_src>

<mosaic_0001>
module attributes {stable_mosaic.version = 11 : i64} {
  func.func @kernel(%arg0: i32, %arg1: i32, %arg2: memref<16x128xf32, #tpu.memory_space<vmem>>, %arg3: memref<16x128xf32, #tpu.memory_space<vmem>>, %arg4: memref<1x1xf32, #tpu.memory_space<vmem>>, %arg5: memref<1x1xf32, #tpu.memory_space<vmem>>, %arg6: memref<8x128xf32, #tpu.memory_space<vmem>>, %arg7: memref<8x128xf32, #tpu.memory_space<vmem>>) attributes {dimension_semantics = [#tpu.dimension_semantics<parallel>, #tpu.dimension_semantics<arbitrary>], iteration_bounds = array<i64: 1, 1>, scalar_prefetch = 0 : i64, scratch_operands = 2 : i64, tpu.core_type = #tpu.core_type<tc>, window_params = [{transform_indices = @transform_0, window_bounds = array<i64: 16, 128>}, {transform_indices = @transform_1, window_bounds = array<i64: 16, 128>}, {transform_indices = @transform_2, window_bounds = array<i64: 1, 1>}, {transform_indices = @transform_3, window_bounds = array<i64: 1, 1>}]} {
    %c0_i32 = arith.constant 0 : i32
    %0 = arith.cmpi eq, %arg1, %c0_i32 : i32
    %1 = arith.extui %0 : i1 to i32
    %c0_i32_0 = arith.constant 0 : i32
    %2 = arith.cmpi ne, %1, %c0_i32_0 : i32
    scf.if %2 {
      %cst_16 = arith.constant 0.000000e+00 : f32
      %35 = vector.broadcast %cst_16 : f32 to vector<8x128xf32>
      %c0_17 = arith.constant 0 : index
      %c0_18 = arith.constant 0 : index
      %36 = vector.load %arg6[%c0_17, %c0_18] : memref<8x128xf32, #tpu.memory_space<vmem>>, vector<8x128xf32>
      tpu.vector_store %arg6[%c0_17, %c0_18], %35 {strides = array<i32>} : memref<8x128xf32, #tpu.memory_space<vmem>>, vector<8x128xf32>,
      %cst_19 = arith.constant 0.000000e+00 : f32
      %37 = vector.broadcast %cst_19 : f32 to vector<8x128xf32>
      %c0_20 = arith.constant 0 : index
      %c0_21 = arith.constant 0 : index
      %38 = vector.load %arg7[%c0_20, %c0_21] : memref<8x128xf32, #tpu.memory_space<vmem>>, vector<8x128xf32>
      tpu.vector_store %arg7[%c0_20, %c0_21], %37 {strides = array<i32>} : memref<8x128xf32, #tpu.memory_space<vmem>>, vector<8x128xf32>,
    } else {
    }
    %cst = arith.constant 0.000000e+00 : f32
    %3 = vector.broadcast %cst : f32 to vector<8x128xf32>
    %c0_i32_1 = arith.constant 0 : i32
    %c8_i32 = arith.constant 8 : i32
    %4 = arith.muli %c0_i32_1, %c8_i32 : i32
    %5 = tpu.assume_multiple %4, 8 : i32
    %6 = arith.index_cast %5 : i32 to index
    %c0 = arith.constant 0 : index
    %7 = vector.load %arg2[%6, %c0] : memref<16x128xf32, #tpu.memory_space<vmem>>, vector<8x128xf32>
    %8 = arith.index_cast %5 : i32 to index
    %c0_2 = arith.constant 0 : index
    %9 = vector.load %arg3[%8, %c0_2] : memref<16x128xf32, #tpu.memory_space<vmem>>, vector<8x128xf32>
    %10 = arith.subf %7, %9 : vector<8x128xf32>
    %11 = arith.mulf %10, %10 : vector<8x128xf32>
    %12 = arith.addf %3, %11 : vector<8x128xf32>
    %13 = math.absf %10 : vector<8x128xf32>
    %14 = arith.addf %3, %13 : vector<8x128xf32>
    %c1_i32 = arith.constant 1 : i32
    %c8_i32_3 = arith.constant 8 : i32
    %15 = arith.muli %c1_i32, %c8_i32_3 : i32
    %16 = tpu.assume_multiple %15, 8 : i32
    %17 = arith.index_cast %16 : i32 to index
    %c0_4 = arith.constant 0 : index
    %18 = vector.load %arg2[%17, %c0_4] : memref<16x128xf32, #tpu.memory_space<vmem>>, vector<8x128xf32>
    %19 = arith.index_cast %16 : i32 to index
    %c0_5 = arith.constant 0 : index
    %20 = vector.load %arg3[%19, %c0_5] : memref<16x128xf32, #tpu.memory_space<vmem>>, vector<8x128xf32>
    %21 = arith.subf %18, %20 : vector<8x128xf32>
    %22 = arith.mulf %21, %21 : vector<8x128xf32>
    %23 = arith.addf %12, %22 : vector<8x128xf32>
    %24 = math.absf %21 : vector<8x128xf32>
    %25 = arith.addf %14, %24 : vector<8x128xf32>
    %c2_i32 = arith.constant 2 : i32
    %c0_6 = arith.constant 0 : index
    %c0_7 = arith.constant 0 : index
    %26 = vector.load %arg6[%c0_6, %c0_7] : memref<8x128xf32, #tpu.memory_space<vmem>>, vector<8x128xf32>
    %27 = arith.addf %26, %23 : vector<8x128xf32>
    %c0_8 = arith.constant 0 : index
    %c0_9 = arith.constant 0 : index
    %28 = vector.load %arg6[%c0_8, %c0_9] : memref<8x128xf32, #tpu.memory_space<vmem>>, vector<8x128xf32>
    tpu.vector_store %arg6[%c0_8, %c0_9], %27 {strides = array<i32>} : memref<8x128xf32, #tpu.memory_space<vmem>>, vector<8x128xf32>,
    %c0_10 = arith.constant 0 : index
    %c0_11 = arith.constant 0 : index
    %29 = vector.load %arg7[%c0_10, %c0_11] : memref<8x128xf32, #tpu.memory_space<vmem>>, vector<8x128xf32>
    %30 = arith.addf %29, %25 : vector<8x128xf32>
    %c0_12 = arith.constant 0 : index
    %c0_13 = arith.constant 0 : index
    %31 = vector.load %arg7[%c0_12, %c0_13] : memref<8x128xf32, #tpu.memory_space<vmem>>, vector<8x128xf32>
    tpu.vector_store %arg7[%c0_12, %c0_13], %30 {strides = array<i32>} : memref<8x128xf32, #tpu.memory_space<vmem>>, vector<8x128xf32>,
    %c0_i32_14 = arith.constant 0 : i32
    %32 = arith.cmpi eq, %arg1, %c0_i32_14 : i32
    %33 = arith.extui %32 : i1 to i32
    %c0_i32_15 = arith.constant 0 : i32
    %34 = arith.cmpi ne, %33, %c0_i32_15 : i32
    scf.if %34 {
      %c0_16 = arith.constant 0 : index
      %c0_17 = arith.constant 0 : index
      %35 = vector.load %arg6[%c0_16, %c0_17] : memref<8x128xf32, #tpu.memory_space<vmem>>, vector<8x128xf32>
      %36 = vector.shape_cast %35 : vector<8x128xf32> to vector<1x8x128xf32>
      %cst_18 = arith.constant dense<0.000000e+00> : vector<1xf32>
      %37 = vector.multi_reduction <add>, %36, %cst_18 [1, 2] : vector<1x8x128xf32> to vector<1xf32>
      %38 = vector.shape_cast %37 : vector<1xf32> to vector<1x1x1xf32>
      %39 = vector.extract %38[0, 0, 0] : f32 from vector<1x1x1xf32>
      %40 = vector.broadcast %39 : f32 to vector<1x1xf32>
      %c0_19 = arith.constant 0 : index
      %c0_20 = arith.constant 0 : index
      %41 = vector.load %arg4[%c0_19, %c0_20] : memref<1x1xf32, #tpu.memory_space<vmem>>, vector<1x1xf32>
      tpu.vector_store %arg4[%c0_19, %c0_20], %40 {strides = array<i32>} : memref<1x1xf32, #tpu.memory_space<vmem>>, vector<1x1xf32>,
      %c0_21 = arith.constant 0 : index
      %c0_22 = arith.constant 0 : index
      %42 = vector.load %arg7[%c0_21, %c0_22] : memref<8x128xf32, #tpu.memory_space<vmem>>, vector<8x128xf32>
      %43 = vector.shape_cast %42 : vector<8x128xf32> to vector<1x8x128xf32>
      %cst_23 = arith.constant dense<0.000000e+00> : vector<1xf32>
      %44 = vector.multi_reduction <add>, %43, %cst_23 [1, 2] : vector<1x8x128xf32> to vector<1xf32>
      %45 = vector.shape_cast %44 : vector<1xf32> to vector<1x1x1xf32>
      %46 = vector.extract %45[0, 0, 0] : f32 from vector<1x1x1xf32>
      %47 = vector.broadcast %46 : f32 to vector<1x1xf32>
      %c0_24 = arith.constant 0 : index
      %c0_25 = arith.constant 0 : index
      %48 = vector.load %arg5[%c0_24, %c0_25] : memref<1x1xf32, #tpu.memory_space<vmem>>, vector<1x1xf32>
      tpu.vector_store %arg5[%c0_24, %c0_25], %47 {strides = array<i32>} : memref<1x1xf32, #tpu.memory_space<vmem>>, vector<1x1xf32>,
    } else {
    }
    return
  }
  func.func @transform_0(%arg0: i32, %arg1: i32) -> (i32, i32) {
    %c1_i32 = arith.constant 1 : i32
    %0 = arith.muli %arg0, %c1_i32 : i32
    %1 = arith.addi %0, %arg1 : i32
    %c0_i32 = arith.constant 0 : i32
    %2 = arith.minsi %1, %c0_i32 : i32
    %c0_i32_0 = arith.constant 0 : i32
    %c0_i32_1 = arith.constant 0 : i32
    return %2, %c0_i32_0 : i32, i32
  }
  func.func @transform_1(%arg0: i32, %arg1: i32) -> (i32, i32) {
    %c1_i32 = arith.constant 1 : i32
    %0 = arith.muli %arg0, %c1_i32 : i32
    %1 = arith.addi %0, %arg1 : i32
    %c0_i32 = arith.constant 0 : i32
    %2 = arith.minsi %1, %c0_i32 : i32
    %c0_i32_0 = arith.constant 0 : i32
    %c0_i32_1 = arith.constant 0 : i32
    return %2, %c0_i32_0 : i32, i32
  }
  func.func @transform_2(%arg0: i32, %arg1: i32) -> (i32, i32) {
    %c0_i32 = arith.constant 0 : i32
    %c0_i32_0 = arith.constant 0 : i32
    return %arg0, %c0_i32 : i32, i32
  }
  func.func @transform_3(%arg0: i32, %arg1: i32) -> (i32, i32) {
    %c0_i32 = arith.constant 0 : i32
    %c0_i32_0 = arith.constant 0 : i32
    return %arg0, %c0_i32 : i32, i32
  }
}

</mosaic_0001>

<bundles_post_ra>
// kernel: tpu_custom_call.1
= control target key start
LH: loop header
LB: loop body
LE: loop exit
PB: predicated region body
PF: predicated region fallthrough
CT: control target
= control target key end

     0   :  { %9 = vsyncpa [#allocation5], 0  ;;  %s335_s0 = inlined_call_operand.hbm [shape: f32[16,128], index: 0, kind: input, shape index: {}]   ;;  %s336_s1 = inlined_call_operand.hbm [shape: f32[16,128], index: 1, kind: input, shape index: {}]   ;;  %s337_s2 = inlined_call_operand.hbm [shape: f32[1,1], index: 2, kind: output, shape index: {0}]   ;;  %s338_s3 = inlined_call_operand.hbm [shape: f32[1,1], index: 3, kind: output, shape index: {1}]  }
   0x1   :  { %10 = vsyncpa [#allocation8], 0 }
   0x2   :  { %11 = vsyncpa [#allocation6], 0 }
   0x3   :  { %12 = vsyncpa [#allocation11], 0  ;;  %s259_s12 = smov [#allocation4]   ;;  %s163_s16 = scalar_lea.hbm %s335_s0, 256 }
   0x4   :  { %s24_s13 = sshll.u32 %s259_s12, 4  ;;  %p164_p0 = scmp.ne.s32.totalorder %s335_s0, %s163_s16  ;;  %s25_s13 = int_to_ptr.vmem [resolvable:$true] %s24_s13 }
   0x5   :  { %p167_p1 = scmp.lt.u32.totalorder %s163_s16, %s335_s0 }
   0x7   :  { %p169_p2 = pnand %p167_p1, %p164_p0 }
   0x9   :  { %172 = shalt.err (!%p169_p2)
}
   0xa   :  { %s173_s21 = scalar_lea.vmem %s25_s13, 256  ;;  %p178_p4 = scmp.lt.s32.totalorder %s25_s13, %s25_s13 }
   0xb   :  { %p174_p3 = scmp.ne.s32.totalorder %s25_s13, %s173_s21  ;;  %p179_p5 = scmp.lt.s32.totalorder %s173_s21, %s173_s21 }
   0xd   :  { %p180_p6 = por %p179_p5, %p178_p4 }
   0xf   :  { %p181_p7 = pnand %p180_p6, %p174_p3 }
  0x11   :  { %184 = shalt.err (!%p181_p7)
}
  0x12   :  { %s260_s22 = smov 128   ;;  %s261_s23 = smov 8  }
  0x13   :  { %30 = dma.hbm_to_vmem [thread:$0]  %s335_s0, 256, %s25_s13, [#allocation5], %s260_s22, %s260_s22, %s261_s23  }
  0x14   :  { %s262_s26 = smov [#allocation7]   ;;  %s185_s30 = scalar_lea.hbm %s336_s1, 256 }
  0x15   :  { %s42_s27 = sshll.u32 %s262_s26, 4  ;;  %p186_p8 = scmp.ne.s32.totalorder %s336_s1, %s185_s30  ;;  %s43_s27 = int_to_ptr.vmem [resolvable:$true] %s42_s27 }
  0x16   :  { %p189_p9 = scmp.lt.u32.totalorder %s185_s30, %s336_s1 }
  0x18   :  { %p191_p10 = pnand %p189_p9, %p186_p8 }
  0x1a   :  { %194 = shalt.err (!%p191_p10)
}
  0x1b   :  { %s195_s8 = scalar_lea.vmem %s43_s27, 256  ;;  %p200_p12 = scmp.lt.s32.totalorder %s43_s27, %s43_s27 }
  0x1c   :  { %p196_p11 = scmp.ne.s32.totalorder %s43_s27, %s195_s8  ;;  %p201_p13 = scmp.lt.s32.totalorder %s195_s8, %s195_s8 }
  0x1e   :  { %p202_p0 = por %p201_p13, %p200_p12 }
  0x20   :  { %p203_p1 = pnand %p202_p0, %p196_p11 }
  0x22   :  { %206 = shalt.err (!%p203_p1)
}
  0x23   :  { %48 = dma.hbm_to_vmem [thread:$0]  %s336_s1, 256, %s43_s27, [#allocation8], %s260_s22, %s260_s22, %s261_s23  }
  0x24   :  { %251 = dma.done.wait [#allocation5], 256  }
  0x25   :  { %252 = vsyncadd [#allocation5], 4294967040 }
  0x26   :  { %253 = dma.done.wait [#allocation8], 256  }
  0x27   :  { %254 = vsyncadd [#allocation8], 4294967040  ;;  %v69_v0 = vld [vmem:[#allocation4] sm:$0xff]  ;;  %v70_v1 = vld [vmem:[#allocation7] sm:$0xff]  ;;  %s263_s1 = smov [#allocation9]   ;;  %vm105_vm0 = vcmask 0  }
  0x28   :  { %v77_v2 = vld [vmem:[#allocation4 + $0x8] sm:$0xff]  ;;  %v71_v3 = vsub.f32 %v69_v0, %v70_v1  ;;  %v79_v4 = vld [vmem:[#allocation7 + $0x8] sm:$0xff]  ;;  %s125_s10 = sshll.u32 %s263_s1, 4  ;;  %s264_s12 = smov [#allocation10]   ;;  %s126_s10 = int_to_ptr.vmem [resolvable:$true] %s125_s10 }
  0x29   :  { %v80_v5 = vsub.f32 %v77_v2, %v79_v4  ;;  %s135_s13 = sshll.u32 %s264_s12, 4  ;;  %s207_s14 = scalar_lea.vmem %s126_s10, 16  ;;  %s136_s13 = int_to_ptr.vmem [resolvable:$true] %s135_s13 }
  0x2a   :  { %v72_v6 = vmul.f32 %v71_v3, %v71_v3  ;;  %v74_v8 = vand.u32 2147483647, %v71_v3  ;;  %p208_p2 = scmp.ne.s32.totalorder %s126_s10, %s207_s14  ;;  %s211_s15 = scalar_lea.vmem %s126_s10, 32 }
  0x2b   :  { %v81_v7 = vmul.f32 %v80_v5, %v80_v5  ;;  %v83_v9 = vand.u32 2147483647, %v80_v5  ;;  %p212_p3 = scmp.lt.s32.totalorder %s126_s10, %s126_s10  ;;  %p213_p4 = scmp.lt.s32.totalorder %s211_s15, %s207_s14 }
  0x2d   :  { %v82_v10 = vadd.f32 %v81_v7, %v72_v6  ;;  %v84_v11 = vadd.f32 %v83_v9, %v74_v8  ;;  %p214_p5 = por %p213_p4, %p212_p3 }
  0x2f   :  { %95 = vadd.xlane.f32.xlu0 %v82_v10  ;;  %p215_p6 = pnand %p214_p5, %p208_p2 }
  0x33   :  { %108 = vadd.xlane.f32.xlu0 %v84_v11 }
  0xbc   :  { %v96_v12 = vpop.xlane.xlu0 %95 }
  0xbd   :  { %v97_v13 = vrot.slane %v96_v12, 4 }
  0xbf   :  { %v98_v14 = vadd.f32 %v97_v13, %v96_v12 }
  0xc0   :  { %v109_v15 = vpop.xlane.xlu0 %108 }
  0xc1   :  { %v99_v16 = vrot.slane %v98_v14, 2  ;;  %v110_v17 = vrot.slane %v109_v15, 4 }
  0xc3   :  { %v111_v18 = vadd.f32 %v110_v17, %v109_v15  ;;  %v100_v19 = vadd.f32 %v99_v16, %v98_v14 }
  0xc5   :  { %v112_v20 = vrot.slane %v111_v18, 2  ;;  %v101_v21 = vrot.slane %v100_v19, 1 }
  0xc7   :  { %v113_v22 = vadd.f32 %v112_v20, %v111_v18  ;;  %v102_v23 = vadd.f32 %v101_v21, %v100_v19 }
  0xc9   :  { %153 = vpush %v102_v23  ;;  %v114_v24 = vrot.slane %v113_v22, 1 }
  0xcb   :  { %v115_v25 = vadd.f32 %v114_v24, %v113_v22 }
  0xcd   :  { %155 = vpush %v115_v25 }
  0xfa   :  { %s154_s11 = spop %153 }
  0xfb   :  { %v104_v26 = vstv %s154_s11 }
  0xfc   :  { %106 = vst.msk [vmem:[#allocation9] sm:$0x1] %vm105_vm0, %v104_v26 }
  0xfd   :  { %218 = shalt.err (!%p215_p6)
}
  0xfe   :  { %s219_s18 = scalar_lea.hbm %s337_s2, 16 }
  0xff   :  { %p220_p7 = scmp.ne.s32.totalorder %s337_s2, %s219_s18  ;;  %p223_p8 = scmp.lt.u32.totalorder %s219_s18, %s337_s2 }
 0x101   :  { %p225_p9 = pnand %p223_p8, %p220_p7 }
 0x103   :  { %228 = shalt.err (!%p225_p9)
}
 0x104   :  { %128 = dma.vmem_to_hbm [thread:$0]  %s126_s10, 16, %s337_s2, [#allocation6]  }
 0x105   :  { %s156_s25 = spop %155  ;;  %s229_s26 = scalar_lea.vmem %s136_s13, 16 }
 0x106   :  { %v117_v27 = vstv %s156_s25  ;;  %p230_p10 = scmp.ne.s32.totalorder %s136_s13, %s229_s26  ;;  %s233_s27 = scalar_lea.vmem %s136_s13, 32 }
 0x107   :  { %118 = vst.msk [vmem:[#allocation10] sm:$0x1] %vm105_vm0, %v117_v27  ;;  %p234_p11 = scmp.lt.s32.totalorder %s136_s13, %s136_s13  ;;  %p235_p12 = scmp.lt.s32.totalorder %s233_s27, %s229_s26 }
 0x109   :  { %p236_p13 = por %p235_p12, %p234_p11 }
 0x10b   :  { %p237_p0 = pnand %p236_p13, %p230_p10 }
 0x10d   :  { %240 = shalt.err (!%p237_p0)
}
 0x10e   :  { %s241_s30 = scalar_lea.hbm %s338_s3, 16 }
 0x10f   :  { %p242_p1 = scmp.ne.s32.totalorder %s338_s3, %s241_s30  ;;  %p245_p2 = scmp.lt.u32.totalorder %s241_s30, %s338_s3 }
 0x111   :  { %p247_p3 = pnand %p245_p2, %p242_p1 }
 0x113   :  { %250 = shalt.err (!%p247_p3)
}
 0x114   :  { %138 = dma.vmem_to_hbm [thread:$0]  %s136_s13, 16, %s338_s3, [#allocation11]  }
 0x115   :  { %255 = dma.done.wait [#allocation6], 16  }
 0x116   :  { %256 = vsyncadd [#allocation6], 4294967280 }
 0x117   :  { %257 = dma.done.wait [#allocation11], 16  }
 0x118   :  { %258 = vsyncadd [#allocation11], 4294967280 }
 0x119   :  { %145 = vsyncpa [#allocation5], 1 }
 0x11a   :  { %146 = vsyncpa [#allocation8], 1 }
 0x11b   :  { %147 = vsyncpa [#allocation6], 1 }
 0x11c   :  { %148 = vsyncpa [#allocation11], 1 }

</bundles_post_ra>
